<compile_context>
chip_gen: v7x
topology: tpu7x:2x2x1
jax: 0.10.0
libtpu: 0.0.40
codegen_flags: <defaults>
</compile_context>

<pallas_src>
import jax
import jax.numpy as jnp
from jax.experimental import pallas as pl
from jax.experimental.pallas import tpu as pltpu


# ----------------------------------------------------------------------------- kernel

def _mlp_kernel(inv_t_ref, x_ref,
                w1_ref, b1_ref, w2_ref, b2_ref, w3_ref, b3_ref,
                w4_ref, b4_ref, w5_ref, b5_ref,
                out_ref):
    """One batch tile: 4x (folded Linear+BN -> ReLU), final Linear, softmax(T).

    out_ref is a packed (tb, 2*CP) buffer: [:, :CP] = logits, [:, CP:] = probs,
    where CP is the lane-padded (multiple-of-128) class count.
    """
    inv_t = inv_t_ref[0, 0]

    def lin_relu(h, w_ref, b_ref):
        z = jnp.dot(h.astype(w_ref.dtype), w_ref[...],
                    preferred_element_type=jnp.float32) + b_ref[...]
        return jnp.maximum(z, 0.0)

    h = x_ref[...]
    h = lin_relu(h, w1_ref, b1_ref)   # fc1+bn1 (folded) -> relu
    h = lin_relu(h, w2_ref, b2_ref)   # fc2+bn2 -> relu (-> dropout: identity in eval)
    h = lin_relu(h, w3_ref, b3_ref)   # fc3+bn3 -> relu (-> dropout: identity in eval)
    h = lin_relu(h, w4_ref, b4_ref)   # fc4+bn4 -> relu

    logits = jnp.dot(h.astype(w5_ref.dtype), w5_ref[...],
                     preferred_element_type=jnp.float32) + b5_ref[...]

    # softmax(logits * (1/T), dim=1). Padded classes carry bias -1e30 -> exp underflows
    # to exactly 0, so they contribute nothing to the denominator.
    z = logits * inv_t
    z = z - jnp.max(z, axis=1, keepdims=True)
    e = jnp.exp(z)
    probs = e / jnp.sum(e, axis=1, keepdims=True)     # exact normalization

    cp = logits.shape[1]                               # lane-padded class count (static)
    out_ref[:, :cp] = logits.astype(out_ref.dtype)
    out_ref[:, cp:] = probs.astype(out_ref.dtype)


# ---------------------------------------------------------------------------- wrapper

def _round_up(n, m):
    return (n + m - 1) // m * m


def optd_forward(x, folded_params, temperature=1.0, *,
                 block_b=1024, compute_dtype=jnp.bfloat16):
    """Run the fused MLP. `folded_params` comes from fold_params(). Returns (logits, probs)."""
    B, F = x.shape
    C = folded_params["num_classes"]
    CP = folded_params["w5"].shape[1]     # lane-padded class count (multiple of 128)

    # ---- batch tiling: even split into >=2 steps when possible (v7x megacore), no blowup.
    rounded = _round_up(max(B, 8), 8)
    n_steps = max(pl.cdiv(rounded, block_b), 2 if rounded >= 16 else 1)
    tb = _round_up(pl.cdiv(rounded, n_steps), 8)
    padded_b = n_steps * tb
    grid = (n_steps,)

    x_p = x.astype(compute_dtype)
    if padded_b != B:
        x_p = jnp.pad(x_p, ((0, padded_b - B), (0, 0)))

    inv_t = jnp.full((1, 1), 1.0 / float(temperature), jnp.float32)

    weights = []
    in_specs = [
        # 1/T scalar lives in SMEM -> no recompile when temperature changes.
        pl.BlockSpec((1, 1), lambda i: (0, 0),
                     memory_space=pltpu.MemorySpace.SMEM),
        # x is tiled over the batch grid (double-buffered by Pallas).
        pl.BlockSpec((tb, F), lambda i: (i, 0)),
    ]
    for l in range(1, 6):
        w = folded_params[f"w{l}"].astype(compute_dtype)           # (in, out) MXU operand
        b = folded_params[f"b{l}"].astype(jnp.float32).reshape(1, -1)
        weights += [w, b]
        # Weights/biases: full block, constant index_map -> VMEM-resident across the grid.
        in_specs += [pl.BlockSpec(w.shape, lambda i: (0, 0)),
                     pl.BlockSpec(b.shape, lambda i: (0, 0))]

    out = pl.pallas_call(
        _mlp_kernel,
        grid=grid,
        in_specs=in_specs,
        out_specs=pl.BlockSpec((tb, 2 * CP), lambda i: (i, 0)),
        out_shape=jax.ShapeDtypeStruct((padded_b, 2 * CP), jnp.float32),
        compiler_params=pltpu.CompilerParams(
            dimension_semantics=("parallel",)),   # shard batch tiles across TCs on v7x
    )(inv_t, x_p, *weights)

    logits = out[:B, :C]
    probs = out[:B, CP:CP + C]
    return logits, probs


# ----------------------------------------------------------------- params & reference

def init_params(key, input_dim, num_classes):
    """PyTorch-shaped raw parameters: W{l} (out,in), bias{l} (out,), BN stats for l<=4.

    BN stats are randomized (not identity) so that the fold is actually exercised.
    """
    dims = [input_dim, 128, 64, 32, 16, num_classes]
    params = {}
    keys = jax.random.split(key, 30)
    k = 0
    for l in range(1, 6):
        fan_in, fan_out = dims[l - 1], dims[l]
        bound = 1.0 / jnp.sqrt(jnp.float32(fan_in))
        params[f"W{l}"] = jax.random.uniform(
            keys[k], (fan_out, fan_in), jnp.float32, -bound, bound); k += 1
        params[f"bias{l}"] = jax.random.uniform(
            keys[k], (fan_out,), jnp.float32, -bound, bound); k += 1
        if l <= 4:
            params[f"gamma{l}"] = 1.0 + 0.1 * jax.random.normal(keys[k], (fan_out,)); k += 1
            params[f"beta{l}"] = 0.1 * jax.random.normal(keys[k], (fan_out,)); k += 1
            params[f"mean{l}"] = 0.1 * jax.random.normal(keys[k], (fan_out,)); k += 1
            params[f"var{l}"] = jnp.abs(
                1.0 + 0.1 * jax.random.normal(keys[k], (fan_out,))); k += 1
    return params


def fold_params(raw, eps=1e-5, lane=128, neg_fill=-1e30):
    """Fold eval-mode BatchNorm into the preceding Linear; weights stored (in, out).

    The final layer is lane-padded: w5 -> (16, round_up(C,128)) with zero columns and
    b5 padded with -1e30 so the padded classes get softmax probability exactly 0.
    """
    folded = {}
    for l in range(1, 6):
        w = raw[f"W{l}"].T          # (in, out)
        b = raw[f"bias{l}"]         # (out,)
        if l <= 4:
            scale = raw[f"gamma{l}"] / jnp.sqrt(raw[f"var{l}"] + eps)
            w = w * scale[None, :]
            b = (b - raw[f"mean{l}"]) * scale + raw[f"beta{l}"]
        folded[f"w{l}"] = w
        folded[f"b{l}"] = b
    C = folded["w5"].shape[1]
    CP = _round_up(C, lane)
    if CP != C:
        folded["w5"] = jnp.pad(folded["w5"], ((0, 0), (0, CP - C)))
        folded["b5"] = jnp.pad(folded["b5"], (0, CP - C), constant_values=neg_fill)
    folded["num_classes"] = C
    return folded


def reference_forward(x, raw, temperature=1.0, eps=1e-5):
    """Unfused pure-JAX reference matching the PyTorch module in eval mode."""
    h = x
    for l in range(1, 5):
        z = h @ raw[f"W{l}"].T + raw[f"bias{l}"]
        z = (z - raw[f"mean{l}"]) / jnp.sqrt(raw[f"var{l}"] + eps)
        z = z * raw[f"gamma{l}"] + raw[f"beta{l}"]
        h = jnp.maximum(z, 0.0)
    logits = h @ raw["W5"].T + raw["bias5"]
    z = logits / temperature
    z = z - jnp.max(z, axis=1, keepdims=True)
    e = jnp.exp(z)
    probs = e / jnp.sum(e, axis=1, keepdims=True)
    return logits, probs


# ------------------------------------------------------------------------------- main

if __name__ == "__main__":
    key = jax.random.PRNGKey(0)
    k_x, k_x2, k_p = jax.random.split(key, 3)

    input_dim, num_classes = 32, 10
    raw = init_params(k_p, input_dim, num_classes)
    folded = fold_params(raw)

    # Case 1: f32 path, batch already a multiple of 8 -> tight tolerances.
    x = jax.random.normal(k_x, (8, input_dim), jnp.float32)
    logits, probs = optd_forward(x, folded, temperature=1.7,
                                 compute_dtype=jnp.float32)
    jax.block_until_ready((logits, probs))

    ref_logits, ref_probs = reference_forward(x, raw, temperature=1.7)
    assert logits.shape == (8, num_classes) and probs.shape == (8, num_classes)
    assert jnp.allclose(logits, ref_logits, atol=1e-4, rtol=1e-4)
    assert jnp.allclose(probs, ref_probs, atol=1e-3, rtol=1e-3)
    assert jnp.allclose(jnp.sum(probs, axis=1), 1.0, atol=1e-3)

    # Case 2: ragged batch + default bf16 MXU operands (pad-and-slice + 2-step grid path).
    x2 = jax.random.normal(k_x2, (10, input_dim), jnp.float32)
    logits2, probs2 = optd_forward(x2, folded, temperature=1.0)   # bf16 default
    jax.block_until_ready((logits2, probs2))

    ref_logits2, ref_probs2 = reference_forward(x2, raw, temperature=1.0)
    assert logits2.shape == (10, num_classes) and probs2.shape == (10, num_classes)
    assert jnp.allclose(logits2, ref_logits2, atol=0.3, rtol=0.1)   # bf16 operand precision
    assert jnp.allclose(probs2, ref_probs2, atol=0.06, rtol=0.1)
    assert jnp.allclose(jnp.sum(probs2, axis=1), 1.0, atol=2e-3)    # exact normalization

    print("KERNEL_OK")
</pallas_src>

<mosaic_0001>
module attributes {stable_mosaic.version = 11 : i64} {
  func.func @_mlp_kernel(%arg0: i32, %arg1: memref<1x1xf32, #tpu.memory_space<smem>>, %arg2: memref<8x32xf32, #tpu.memory_space<vmem>>, %arg3: memref<32x128xf32, #tpu.memory_space<vmem>>, %arg4: memref<1x128xf32, #tpu.memory_space<vmem>>, %arg5: memref<128x64xf32, #tpu.memory_space<vmem>>, %arg6: memref<1x64xf32, #tpu.memory_space<vmem>>, %arg7: memref<64x32xf32, #tpu.memory_space<vmem>>, %arg8: memref<1x32xf32, #tpu.memory_space<vmem>>, %arg9: memref<32x16xf32, #tpu.memory_space<vmem>>, %arg10: memref<1x16xf32, #tpu.memory_space<vmem>>, %arg11: memref<16x128xf32, #tpu.memory_space<vmem>>, %arg12: memref<1x128xf32, #tpu.memory_space<vmem>>, %arg13: memref<8x256xf32, #tpu.memory_space<vmem>>) attributes {dimension_semantics = [#tpu.dimension_semantics<parallel>], iteration_bounds = array<i64: 1>, scalar_prefetch = 0 : i64, scratch_operands = 0 : i64, tpu.core_type = #tpu.core_type<tc>, window_params = [{transform_indices = @transform_0, window_bounds = array<i64: 1, 1>}, {transform_indices = @transform_1, window_bounds = array<i64: 8, 32>}, {pipeline_mode = #tpu.pipeline_mode<synchronous>, transform_indices = @transform_2, window_bounds = array<i64: 32, 128>}, {pipeline_mode = #tpu.pipeline_mode<synchronous>, transform_indices = @transform_3, window_bounds = array<i64: 1, 128>}, {pipeline_mode = #tpu.pipeline_mode<synchronous>, transform_indices = @transform_4, window_bounds = array<i64: 128, 64>}, {pipeline_mode = #tpu.pipeline_mode<synchronous>, transform_indices = @transform_5, window_bounds = array<i64: 1, 64>}, {pipeline_mode = #tpu.pipeline_mode<synchronous>, transform_indices = @transform_6, window_bounds = array<i64: 64, 32>}, {pipeline_mode = #tpu.pipeline_mode<synchronous>, transform_indices = @transform_7, window_bounds = array<i64: 1, 32>}, {pipeline_mode = #tpu.pipeline_mode<synchronous>, transform_indices = @transform_8, window_bounds = array<i64: 32, 16>}, {pipeline_mode = #tpu.pipeline_mode<synchronous>, transform_indices = @transform_9, window_bounds = array<i64: 1, 16>}, {pipeline_mode = #tpu.pipeline_mode<synchronous>, transform_indices = @transform_10, window_bounds = array<i64: 16, 128>}, {pipeline_mode = #tpu.pipeline_mode<synchronous>, transform_indices = @transform_11, window_bounds = array<i64: 1, 128>}, {transform_indices = @transform_12, window_bounds = array<i64: 8, 256>}]} {
    %c0 = arith.constant 0 : index
    %c0_0 = arith.constant 0 : index
    %0 = memref.load %arg1[%c0, %c0_0] : memref<1x1xf32, #tpu.memory_space<smem>>
    %c0_1 = arith.constant 0 : index
    %c0_2 = arith.constant 0 : index
    %1 = vector.load %arg2[%c0_1, %c0_2] : memref<8x32xf32, #tpu.memory_space<vmem>>, vector<8x32xf32>
    %c0_3 = arith.constant 0 : index
    %c0_4 = arith.constant 0 : index
    %2 = vector.load %arg3[%c0_3, %c0_4] : memref<32x128xf32, #tpu.memory_space<vmem>>, vector<32x128xf32>
    %cst = arith.constant dense<0.000000e+00> : vector<8x128xf32>
    %3 = tpu.matmul %1, %2, %cst {dimension_numbers = #tpu.dot_dimension_numbers<[1], [0], [0], [1], [0, 0, 1, 1], [], []>} : vector<8x32xf32>, vector<32x128xf32>, vector<8x128xf32> -> vector<8x128xf32>
    %c0_5 = arith.constant 0 : index
    %c0_6 = arith.constant 0 : index
    %4 = vector.load %arg4[%c0_5, %c0_6] : memref<1x128xf32, #tpu.memory_space<vmem>>, vector<1x128xf32>
    %5 = vector.broadcast %4 : vector<1x128xf32> to vector<8x128xf32>
    %6 = arith.addf %3, %5 : vector<8x128xf32>
    %cst_7 = arith.constant 0.000000e+00 : f32
    %7 = vector.broadcast %cst_7 : f32 to vector<8x128xf32>
    %8 = arith.maximumf %6, %7 : vector<8x128xf32>
    %c0_8 = arith.constant 0 : index
    %c0_9 = arith.constant 0 : index
    %9 = vector.load %arg5[%c0_8, %c0_9] : memref<128x64xf32, #tpu.memory_space<vmem>>, vector<128x64xf32>
    %cst_10 = arith.constant dense<0.000000e+00> : vector<8x64xf32>
    %10 = tpu.matmul %8, %9, %cst_10 {dimension_numbers = #tpu.dot_dimension_numbers<[1], [0], [0], [1], [0, 0, 1, 1], [], []>} : vector<8x128xf32>, vector<128x64xf32>, vector<8x64xf32> -> vector<8x64xf32>
    %c0_11 = arith.constant 0 : index
    %c0_12 = arith.constant 0 : index
    %11 = vector.load %arg6[%c0_11, %c0_12] : memref<1x64xf32, #tpu.memory_space<vmem>>, vector<1x64xf32>
    %12 = vector.broadcast %11 : vector<1x64xf32> to vector<8x64xf32>
    %13 = arith.addf %10, %12 : vector<8x64xf32>
    %cst_13 = arith.constant 0.000000e+00 : f32
    %14 = vector.broadcast %cst_13 : f32 to vector<8x64xf32>
    %15 = arith.maximumf %13, %14 : vector<8x64xf32>
    %c0_14 = arith.constant 0 : index
    %c0_15 = arith.constant 0 : index
    %16 = vector.load %arg7[%c0_14, %c0_15] : memref<64x32xf32, #tpu.memory_space<vmem>>, vector<64x32xf32>
    %cst_16 = arith.constant dense<0.000000e+00> : vector<8x32xf32>
    %17 = tpu.matmul %15, %16, %cst_16 {dimension_numbers = #tpu.dot_dimension_numbers<[1], [0], [0], [1], [0, 0, 1, 1], [], []>} : vector<8x64xf32>, vector<64x32xf32>, vector<8x32xf32> -> vector<8x32xf32>
    %c0_17 = arith.constant 0 : index
    %c0_18 = arith.constant 0 : index
    %18 = vector.load %arg8[%c0_17, %c0_18] : memref<1x32xf32, #tpu.memory_space<vmem>>, vector<1x32xf32>
    %19 = vector.broadcast %18 : vector<1x32xf32> to vector<8x32xf32>
    %20 = arith.addf %17, %19 : vector<8x32xf32>
    %cst_19 = arith.constant 0.000000e+00 : f32
    %21 = vector.broadcast %cst_19 : f32 to vector<8x32xf32>
    %22 = arith.maximumf %20, %21 : vector<8x32xf32>
    %c0_20 = arith.constant 0 : index
    %c0_21 = arith.constant 0 : index
    %23 = vector.load %arg9[%c0_20, %c0_21] : memref<32x16xf32, #tpu.memory_space<vmem>>, vector<32x16xf32>
    %cst_22 = arith.constant dense<0.000000e+00> : vector<8x16xf32>
    %24 = tpu.matmul %22, %23, %cst_22 {dimension_numbers = #tpu.dot_dimension_numbers<[1], [0], [0], [1], [0, 0, 1, 1], [], []>} : vector<8x32xf32>, vector<32x16xf32>, vector<8x16xf32> -> vector<8x16xf32>
    %c0_23 = arith.constant 0 : index
    %c0_24 = arith.constant 0 : index
    %25 = vector.load %arg10[%c0_23, %c0_24] : memref<1x16xf32, #tpu.memory_space<vmem>>, vector<1x16xf32>
    %26 = vector.broadcast %25 : vector<1x16xf32> to vector<8x16xf32>
    %27 = arith.addf %24, %26 : vector<8x16xf32>
    %cst_25 = arith.constant 0.000000e+00 : f32
    %28 = vector.broadcast %cst_25 : f32 to vector<8x16xf32>
    %29 = arith.maximumf %27, %28 : vector<8x16xf32>
    %c0_26 = arith.constant 0 : index
    %c0_27 = arith.constant 0 : index
    %30 = vector.load %arg11[%c0_26, %c0_27] : memref<16x128xf32, #tpu.memory_space<vmem>>, vector<16x128xf32>
    %cst_28 = arith.constant dense<0.000000e+00> : vector<8x128xf32>
    %31 = tpu.matmul %29, %30, %cst_28 {dimension_numbers = #tpu.dot_dimension_numbers<[1], [0], [0], [1], [0, 0, 1, 1], [], []>} : vector<8x16xf32>, vector<16x128xf32>, vector<8x128xf32> -> vector<8x128xf32>
    %c0_29 = arith.constant 0 : index
    %c0_30 = arith.constant 0 : index
    %32 = vector.load %arg12[%c0_29, %c0_30] : memref<1x128xf32, #tpu.memory_space<vmem>>, vector<1x128xf32>
    %33 = vector.broadcast %32 : vector<1x128xf32> to vector<8x128xf32>
    %34 = arith.addf %31, %33 : vector<8x128xf32>
    %35 = vector.broadcast %0 : f32 to vector<8x128xf32>
    %36 = arith.mulf %34, %35 : vector<8x128xf32>
    %cst_31 = arith.constant dense<0xFF800000> : vector<8xf32>
    %37 = vector.multi_reduction <maximumf>, %36, %cst_31 [1] : vector<8x128xf32> to vector<8xf32>
    %38 = vector.shape_cast %37 : vector<8xf32> to vector<8x1xf32>
    %39 = vector.broadcast %38 : vector<8x1xf32> to vector<8x128xf32>
    %40 = arith.subf %36, %39 : vector<8x128xf32>
    %41 = math.exp %40 : vector<8x128xf32>
    %cst_32 = arith.constant dense<0.000000e+00> : vector<8xf32>
    %42 = vector.multi_reduction <add>, %41, %cst_32 [1] : vector<8x128xf32> to vector<8xf32>
    %43 = vector.shape_cast %42 : vector<8xf32> to vector<8x1xf32>
    %44 = vector.broadcast %43 : vector<8x1xf32> to vector<8x128xf32>
    %45 = arith.divf %41, %44 : vector<8x128xf32>
    %c0_33 = arith.constant 0 : index
    %c0_34 = arith.constant 0 : index
    %46 = vector.load %arg13[%c0_33, %c0_34] : memref<8x256xf32, #tpu.memory_space<vmem>>, vector<8x128xf32>
    tpu.vector_store %arg13[%c0_33, %c0_34], %34 {strides = array<i32>} : memref<8x256xf32, #tpu.memory_space<vmem>>, vector<8x128xf32>,
    %c0_35 = arith.constant 0 : index
    %c128 = arith.constant 128 : index
    %47 = vector.load %arg13[%c0_35, %c128] : memref<8x256xf32, #tpu.memory_space<vmem>>, vector<8x128xf32>
    tpu.vector_store %arg13[%c0_35, %c128], %45 {strides = array<i32>} : memref<8x256xf32, #tpu.memory_space<vmem>>, vector<8x128xf32>,
    return
  }
  func.func @transform_0(%arg0: i32) -> (i32, i32) {
    %c0_i32 = arith.constant 0 : i32
    %c0_i32_0 = arith.constant 0 : i32
    %c0_i32_1 = arith.constant 0 : i32
    return %c0_i32, %c0_i32_0 : i32, i32
  }
  func.func @transform_1(%arg0: i32) -> (i32, i32) {
    %c0_i32 = arith.constant 0 : i32
    %c0_i32_0 = arith.constant 0 : i32
    return %arg0, %c0_i32 : i32, i32
  }
  func.func @transform_2(%arg0: i32) -> (i32, i32) {
    %c0_i32 = arith.constant 0 : i32
    %c0_i32_0 = arith.constant 0 : i32
    %c0_i32_1 = arith.constant 0 : i32
    return %c0_i32, %c0_i32_0 : i32, i32
  }
  func.func @transform_3(%arg0: i32) -> (i32, i32) {
    %c0_i32 = arith.constant 0 : i32
    %c0_i32_0 = arith.constant 0 : i32
    %c0_i32_1 = arith.constant 0 : i32
    return %c0_i32, %c0_i32_0 : i32, i32
  }
  func.func @transform_4(%arg0: i32) -> (i32, i32) {
    %c0_i32 = arith.constant 0 : i32
    %c0_i32_0 = arith.constant 0 : i32
    %c0_i32_1 = arith.constant 0 : i32
    return %c0_i32, %c0_i32_0 : i32, i32
  }
  func.func @transform_5(%arg0: i32) -> (i32, i32) {
    %c0_i32 = arith.constant 0 : i32
    %c0_i32_0 = arith.constant 0 : i32
    %c0_i32_1 = arith.constant 0 : i32
    return %c0_i32, %c0_i32_0 : i32, i32
  }
  func.func @transform_6(%arg0: i32) -> (i32, i32) {
    %c0_i32 = arith.constant 0 : i32
    %c0_i32_0 = arith.constant 0 : i32
    %c0_i32_1 = arith.constant 0 : i32
    return %c0_i32, %c0_i32_0 : i32, i32
  }
  func.func @transform_7(%arg0: i32) -> (i32, i32) {
    %c0_i32 = arith.constant 0 : i32
    %c0_i32_0 = arith.constant 0 : i32
    %c0_i32_1 = arith.constant 0 : i32
    return %c0_i32, %c0_i32_0 : i32, i32
  }
  func.func @transform_8(%arg0: i32) -> (i32, i32) {
    %c0_i32 = arith.constant 0 : i32
    %c0_i32_0 = arith.constant 0 : i32
    %c0_i32_1 = arith.constant 0 : i32
    return %c0_i32, %c0_i32_0 : i32, i32
  }
  func.func @transform_9(%arg0: i32) -> (i32, i32) {
    %c0_i32 = arith.constant 0 : i32
    %c0_i32_0 = arith.constant 0 : i32
    %c0_i32_1 = arith.constant 0 : i32
    return %c0_i32, %c0_i32_0 : i32, i32
  }
  func.func @transform_10(%arg0: i32) -> (i32, i32) {
    %c0_i32 = arith.constant 0 : i32
    %c0_i32_0 = arith.constant 0 : i32
    %c0_i32_1 = arith.constant 0 : i32
    return %c0_i32, %c0_i32_0 : i32, i32
  }
  func.func @transform_11(%arg0: i32) -> (i32, i32) {
    %c0_i32 = arith.constant 0 : i32
    %c0_i32_0 = arith.constant 0 : i32
    %c0_i32_1 = arith.constant 0 : i32
    return %c0_i32, %c0_i32_0 : i32, i32
  }
  func.func @transform_12(%arg0: i32) -> (i32, i32) {
    %c0_i32 = arith.constant 0 : i32
    %c0_i32_0 = arith.constant 0 : i32
    return %arg0, %c0_i32 : i32, i32
  }
}

</mosaic_0001>

<bundles_post_ra>
// kernel: tpu_custom_call.1
= control target key start
LH: loop header
LB: loop body
LE: loop exit
PB: predicated region body
PF: predicated region fallthrough
CT: control target
= control target key end

     0   :  { %v724_v3 = vmov 0.0|0.0   ;;  %vm725_vm0 = vmmov 0   ;;  %v726_v6 = vmov 0.0   ;;  %s957_s0 = inlined_call_operand.<no memory space> [shape: f32[1,1], index: 0, kind: input, shape index: {}]   ;;  %s958_s1 = inlined_call_operand.vmem [shape: f32[8,32], index: 1, kind: input, shape index: {}]   ;;  %s959_s2 = inlined_call_operand.vmem [shape: f32[32,128], index: 2, kind: input, shape index: {}]   ;;  %s960_s3 = inlined_call_operand.vmem [shape: f32[1,128], index: 3, kind: input, shape index: {}]   ;;  %s961_s4 = inlined_call_operand.vmem [shape: f32[128,64], index: 4, kind: input, shape index: {}]   ;;  %s962_s5 = inlined_call_operand.vmem [shape: f32[1,64], index: 5, kind: input, shape index: {}]   ;;  %s963_s6 = inlined_call_operand.vmem [shape: f32[64,32], index: 6, kind: input, shape index: {}]   ;;  %s964_s7 = inlined_call_operand.vmem [shape: f32[1,32], index: 7, kind: input, shape index: {}]   ;;  %s965_s8 = inlined_call_operand.vmem [shape: f32[32,16], index: 8, kind: input, shape index: {}]   ;;  %s966_s9 = inlined_call_operand.vmem [shape: f32[1,16], index: 9, kind: input, shape index: {}]   ;;  %s967_s10 = inlined_call_operand.vmem [shape: f32[16,128], index: 10, kind: input, shape index: {}]   ;;  %s968_s11 = inlined_call_operand.vmem [shape: f32[1,128], index: 11, kind: input, shape index: {}]   ;;  %s969_s12 = inlined_call_operand.hbm [shape: f32[8,256], index: 12, kind: output, shape index: {}]  }
   0x1   :  { %v45_v0 = vld [vmem:[%s959_s2] sm:$0xff]  ;;  %v46_v1 = vld [vmem:[%s959_s2 + $0x8] sm:$0xff]  ;;  %v47_v2 = vld [vmem:[%s959_s2 + $0x10] sm:$0xff]  ;;  %641 = vmatprep.subr.bf16.mxu0 %v724_v3  ;;  %566 = vmatprep.mubr.msk.f32.mxu0 %vm725_vm0, %v726_v6 }
   0x2   :  { %v642_v4 = vpack.c.bf16 %v46_v1, %v45_v0  ;;  %v48_v5 = vld [vmem:[%s959_s2 + $0x18] sm:$0xff]  ;;  %v131_v7 = vld [vmem:[%s961_s4] sm:$0xff]  ;;  %647 = vmatprep.subr.bf16.mxu1 %v724_v3  ;;  %v132_v8 = vld [vmem:[%s961_s4 + $0x8] sm:$0xff]  ;;  %601 = vmatprep.mubr.msk.f32.mxu1 %vm725_vm0, %v726_v6 }
   0x3   :  { %v133_v9 = vld [vmem:[%s961_s4 + $0x10] sm:$0xff]  ;;  %v134_v10 = vld [vmem:[%s961_s4 + $0x18] sm:$0xff]  ;;  %v645_v11 = vpack.c.bf16 %v48_v5, %v47_v2  ;;  %v648_v12 = vpack.c.bf16 %v132_v8, %v131_v7  ;;  %v135_v14 = vld [vmem:[%s961_s4 + $0x20] sm:$0xff] }
   0x4   :  { %643 = vmatpush3.bf16.msra.mxu0 %v642_v4  ;;  %v651_v13 = vpack.c.bf16 %v134_v10, %v133_v9  ;;  %v136_v15 = vld [vmem:[%s961_s4 + $0x28] sm:$0xff] }
   0x5   :  { %644 = vmatprep.subr.bf16.mxu0 %v724_v3  ;;  %649 = vmatpush3.bf16.msra.mxu1 %v648_v12 }
   0x6   :  { %650 = vmatprep.subr.bf16.mxu1 %v724_v3 }
   0x7   :  { %18 = vsyncpa [#allocation4], 0  ;;  %v44_v16 = vld [vmem:[%s958_s1] sm:$0xff]  ;;  %vm56_vm1 = vcmask 261120   ;;  %v654_v17 = vpack.c.bf16 %v136_v15, %v135_v14  ;;  %v137_v18 = vld [vmem:[%s961_s4 + $0x30] sm:$0xff]  ;;  %vm240_vm2 = vcmask 523264   ;;  %v483_v12 = vstv %s957_s0 }
   0x8   :  { %646 = vmatpush3.bf16.msra.mxu0 %v645_v11  ;;  %v138_v19 = vld [vmem:[%s961_s4 + $0x38] sm:$0xff]  ;;  %v139_v21 = vld [vmem:[%s961_s4 + $0x40] sm:$0xff]  ;;  %v140_v22 = vld [vmem:[%s961_s4 + $0x48] sm:$0xff]  ;;  %vm409_vm3 = vcmask 130048  }
   0x9   :  { %671 = vmatprep.subr.bf16.mxu0 %v724_v3  ;;  %652 = vmatpush3.bf16.msra.mxu1 %v651_v13  ;;  %v657_v20 = vpack.c.bf16 %v138_v19, %v137_v18  ;;  %v660_v23 = vpack.c.bf16 %v140_v22, %v139_v21  ;;  %v141_v24 = vld [vmem:[%s961_s4 + $0x50] sm:$0xff]  ;;  %v142_v25 = vld [vmem:[%s961_s4 + $0x58] sm:$0xff]  ;;  %v143_v27 = vld [vmem:[%s961_s4 + $0x60] sm:$0xff] }
   0xa   :  { %653 = vmatprep.subr.bf16.mxu1 %v724_v3  ;;  %v663_v26 = vpack.c.bf16 %v142_v25, %v141_v24  ;;  %v144_v28 = vld [vmem:[%s961_s4 + $0x68] sm:$0xff]  ;;  %v145_v30 = vld [vmem:[%s961_s4 + $0x70] sm:$0xff]  ;;  %v146_v31 = vld [vmem:[%s961_s4 + $0x78] sm:$0xff] }
   0xb   :  { %567 = vmatmul.mubr.msk.f32.vlgmr.msra.gmra.mrb[0].mxu0 %vm56_vm1, %v44_v16  ;;  %v666_v29 = vpack.c.bf16 %v144_v28, %v143_v27  ;;  %v669_v32 = vpack.c.bf16 %v146_v31, %v145_v30  ;;  %v225_v33 = vld [vmem:[%s963_s6] sm:$0xff]  ;;  %v226_v34 = vld [vmem:[%s963_s6 + $0x8] sm:$0xff]  ;;  %v227_v35 = vld [vmem:[%s963_s6 + $0x10] sm:$0xff] }
   0xc   :  { %620 = vmatprep.mubr.msk.f32.mxu0 %vm725_vm0, %v726_v6  ;;  %v672_v36 = vpack.c.bf16 %v226_v34, %v225_v33  ;;  %v228_v37 = vld [vmem:[%s963_s6 + $0x18] sm:$0xff]  ;;  %v229_v39 = vld [vmem:[%s963_s6 + $0x20] sm:$0xff]  ;;  %v230_v40 = vld [vmem:[%s963_s6 + $0x28] sm:$0xff] }
   0xd   :  { %655 = vmatpush3.bf16.msra.mxu1 %v654_v17  ;;  %v675_v38 = vpack.c.bf16 %v228_v37, %v227_v35  ;;  %v678_v41 = vpack.c.bf16 %v230_v40, %v229_v39  ;;  %v510_v42 = vld [vmem:[%s960_s3] ss:$0 sm:$0xff]  ;;  %v231_v47 = vld [vmem:[%s963_s6 + $0x30] sm:$0xff]  ;;  %v232_v48 = vld [vmem:[%s963_s6 + $0x38] sm:$0xff] }
   0xe   :  { %656 = vmatprep.subr.bf16.mxu1 %v724_v3  ;;  %673 = vmatpush3.bf16.msra.mxu0 %v672_v36  ;;  %v681_v49 = vpack.c.bf16 %v232_v48, %v231_v47  ;;  %v512_v50 = vld [vmem:[%s962_s5] ss:$0 sm:$0xff]  ;;  %v316_v52 = vld [vmem:[%s965_s8 + $0x8] sm:$0xff]  ;;  %v317_v58 = vld [vmem:[%s965_s8 + $0x10] sm:$0xff] }
   0xf   :  { %674 = vmatprep.subr.bf16.mxu0 %v724_v3  ;;  %v315_v51 = vld [vmem:[%s965_s8] sm:$0xff]  ;;  %v318_v59 = vld [vmem:[%s965_s8 + $0x18] sm:$0xff] }
  0x10   :  { %v684_v56 = vpack.c.bf16 %v316_v52, %v315_v51  ;;  %v687_v60 = vpack.c.bf16 %v318_v59, %v317_v58  ;;  %v513_v61 = vld [vmem:[%s964_s7] ss:$0 sm:$0xff] }
  0x11   :  { %658 = vmatpush3.bf16.msra.mxu1 %v657_v20  ;;  %v400_v2 = vld [vmem:[%s967_s10] sm:$0xff] }
  0x12   :  { %659 = vmatprep.subr.bf16.mxu1 %v724_v3  ;;  %676 = vmatpush3.bf16.msra.mxu0 %v675_v38  ;;  %v515_v5 = vld [vmem:[%s966_s9] ss:$0 sm:$0xff]  ;;  %s727_s9 = smov [#allocation3]  }
  0x13   :  { %677 = vmatprep.subr.bf16.mxu0 %v724_v3 }
  0x15   :  { %661 = vmatpush3.bf16.msra.mxu1 %v660_v23 }
  0x16   :  { %662 = vmatprep.subr.bf16.mxu1 %v724_v3  ;;  %679 = vmatpush3.bf16.msra.mxu0 %v678_v41 }
  0x17   :  { %680 = vmatprep.subr.bf16.mxu0 %v724_v3 }
  0x19   :  { %664 = vmatpush3.bf16.msra.mxu1 %v663_v26 }
  0x1a   :  { %665 = vmatprep.subr.bf16.mxu1 %v724_v3  ;;  %682 = vmatpush3.bf16.msra.mxu0 %v681_v49 }
  0x1b   :  { %683 = vmatprep.subr.bf16.mxu0 %v724_v3 }
  0x1d   :  { %667 = vmatpush3.bf16.msra.mxu1 %v666_v29 }
  0x1e   :  { %668 = vmatprep.subr.bf16.mxu1 %v724_v3 }
  0x21   :  { %670 = vmatpush3.bf16.msra.mxu1 %v669_v32 }
  0xde   :  { %v126_v43 = vpop.f32.mrb[0].mxu0 }
  0xdf   :  { %v127_v44 = vadd.f32 %v510_v42, %v126_v43  ;;  %v568_v45 = vpop.f32.mrb[1].mxu0 }
  0xe1   :  { %v130_v46 = vmax.f32 %v127_v44, 0.0 }
  0xe3   :  { %602 = vmatmul.mubr.f32.vlgmr.msra.gmra.mrb[0].mxu1 %v130_v46 }
 0x1b6   :  { %v220_v53 = vpop.f32.mrb[0].mxu1 }
 0x1b7   :  { %v221_v54 = vadd.f32 %v512_v50, %v220_v53  ;;  %v603_v55 = vpop.f32.mrb[1].mxu1 }
 0x1b9   :  { %v224_v57 = vmax.f32 %v221_v54, 0.0 }
 0x1bb   :  { %621 = vmatmul.mubr.msk.f32.vlgmr.msra.gmra.mrb[2].mxu0 %vm240_vm2, %v224_v57 }
 0x1bc   :  { %685 = vmatpush3.bf16.msra.mxu0 %v684_v56  ;;  %631 = vmatprep.mubr.msk.f32.mxu0 %vm725_vm0, %v726_v6 }
 0x1bd   :  { %686 = vmatprep.subr.bf16.mxu0 %v724_v3 }
 0x1c0   :  { %688 = vmatpush3.bf16.msra.mxu0 %v687_v60 }
 0x1c1   :  { %689 = vmatprep.subr.bf16.mxu0 %v724_v3  ;;  %v401_v3 = vld [vmem:[%s967_s10 + $0x8] sm:$0xff]  ;;  %s502_s10 = sshll.u32 %s727_s9, 4  ;;  %s503_s10 = int_to_ptr.vmem [resolvable:$true] %s502_s10 }
 0x1c2   :  { %v690_v4 = vpack.c.bf16 %v401_v3, %v400_v2  ;;  %s700_s0 = scalar_lea.vmem %s503_s10, 256  ;;  %p705_p1 = scmp.lt.s32.totalorder %s503_s10, %s503_s10 }
 0x1c3   :  { %p701_p0 = scmp.ne.s32.totalorder %s503_s10, %s700_s0  ;;  %p706_p2 = scmp.lt.s32.totalorder %s700_s0, %s700_s0 }
 0x1c5   :  { %p707_p3 = por %p706_p2, %p705_p1 }
 0x1c7   :  { %p708_p4 = pnand %p707_p3, %p701_p0 }
 0x28e   :  { %v310_v62 = vpop.f32.mrb[2].mxu0 }
 0x28f   :  { %v311_v63 = vadd.f32 %v513_v61, %v310_v62  ;;  %v622_v0 = vpop.f32.mrb[3].mxu0 }
 0x291   :  { %v314_v1 = vmax.f32 %v311_v63, 0.0 }
 0x293   :  { %632 = vmatmul.mubr.msk.f32.vlgmr.msra.gmra.mrb[4].mxu0 %vm56_vm1, %v314_v1 }
 0x294   :  { %638 = vmatprep.mubr.msk.f32.mxu0 %vm725_vm0, %v726_v6  ;;  %691 = vmatpush3.bf16.msra.mxu0 %v690_v4  ;;  %v517_v6 = vld [vmem:[%s968_s11] ss:$0 sm:$0xff] }
 0x366   :  { %v395_v7 = vpop.f32.mrb[4].mxu0 }
 0x367   :  { %v396_v8 = vadd.f32 %v515_v5, %v395_v7  ;;  %v633_v9 = vpop.f32.mrb[5].mxu0 }
 0x369   :  { %v399_v10 = vmax.f32 %v396_v8, 0.0 }
 0x36b   :  { %639 = vmatmul.mubr.msk.f32.vlgmr.msra.gmra.mrb[6].mxu0 %vm409_vm3, %v399_v10 }
 0x43e   :  { %v479_v11 = vpop.f32.mrb[6].mxu0 }
 0x43f   :  { %v480_v13 = vadd.f32 %v517_v6, %v479_v11  ;;  %v640_v14 = vpop.f32.mrb[7].mxu0 }
 0x441   :  { %494 = vst [vmem:[#allocation3] sm:$0xff] %v480_v13  ;;  %v484_v15 = vmul.f32 %v483_v12, %v480_v13 }
 0x443   :  { %485 = vmax.xlane.f32.xlu0 %v484_v15 }
 0x4d0   :  { %v486_v16 = vpop.xlane.xlu0 %485 }
 0x4d1   :  { %v487_v17 = vsub.f32 %v484_v15, %v486_v16 }
 0x4d3   :  { %v488_v18 = vmul.f32 1.442695, %v487_v17 }
 0x4d5   :  { %696 = vpow2.f32 %v488_v18 }
 0x4df   :  { %v697_v19 = vpop.eup %696 }
 0x4e0   :  { %490 = vadd.xlane.f32.xlu0 %v697_v19 }
 0x56d   :  { %v491_v20 = vpop.xlane.xlu0 %490 }
 0x56e   :  { %698 = vrcp.f32 %v491_v20 }
 0x578   :  { %v699_v21 = vpop.eup %698 }
 0x579   :  { %v493_v22 = vmul.f32 %v699_v21, %v697_v19 }
 0x57b   :  { %495 = vst [vmem:[#allocation3 + $0x8] sm:$0xff] %v493_v22 }
 0x57c   :  { %711 = shalt.err (!%p708_p4)
}
 0x57d   :  { %s712_s18 = scalar_lea.hbm %s969_s12, 256 }
 0x57e   :  { %p713_p5 = scmp.ne.s32.totalorder %s969_s12, %s712_s18  ;;  %p716_p6 = scmp.lt.u32.totalorder %s712_s18, %s969_s12 }
 0x580   :  { %p718_p7 = pnand %p716_p6, %p713_p5 }
 0x582   :  { %721 = shalt.err (!%p718_p7)
}
 0x583   :  { %505 = dma.vmem_to_hbm [thread:$0]  %s503_s10, 256, %s969_s12, [#allocation4]  }
 0x584   :  { %722 = dma.done.wait [#allocation4], 256  }
 0x585   :  { %723 = vsyncadd [#allocation4], 4294967040 }
 0x586   :  { %509 = vsyncpa [#allocation4], 1 }

</bundles_post_ra>
